<compile_context>
chip_gen: v6e
topology: v6e:2x2x1
jax: 0.10.0
libtpu: 0.0.40
codegen_flags: <defaults>
</compile_context>

<pallas_src>
import jax
import jax.numpy as jnp
from jax.experimental import pallas as pl
from jax.experimental.pallas import tpu as pltpu


def _smatrix_kernel(p_ref, u_ref, v_ref, adj_ref, out_ref):
    # p_ref:   SMEM (1,) f32      mixing coefficient p_Asem
    # u_ref:   VMEM (TB, TM, 1)   row projections  x[b,i]·w_i + bias
    # v_ref:   VMEM (TB, 1, TN)   col projections  x[b,j]·w_j
    # adj_ref: VMEM (TB, TM, TN)  adjacency tile (native dtype)
    # out_ref: VMEM (TB, TM, TN)
    p = p_ref[0]
    score = u_ref[...] + v_ref[...]                      # broadcast outer sum (VPU)
    sig = jax.nn.sigmoid(score)                          # EUP
    mixed = p * sig + (1.0 - p) * adj_ref[...].astype(jnp.float32)
    out_ref[...] = mixed.astype(out_ref.dtype)


def _vmem_capacity_bytes():
    """Per-core VMEM capacity; conservative fallback if the query fails."""
    try:
        info = pltpu.get_tpu_info()
        cap = getattr(info, "vmem_capacity_bytes", None)
        if cap:
            return int(cap)
    except Exception:
        pass
    return 64 * 1024 * 1024          # v7x-sized default (safe everywhere)


def _largest_divisor_leq(n, cap):
    cap = max(1, min(n, cap))
    for d in range(cap, 0, -1):
        if n % d == 0:
            return d
    return 1


def sentence_matrix_layer(x, adj, weight, bias, *, p_asem=0.8, out_dtype=None,
                          force_pallas=False):
    """x: (B, N, D), adj: (B, N, N), weight: (1, 2D), bias: (1,)."""
    B, N, D = x.shape
    assert adj.shape == (B, N, N)
    assert weight.shape == (1, 2 * D)
    assert bias.shape == (1,)

    if out_dtype is None:
        out_dtype = jnp.promote_types(x.dtype, adj.dtype)
    out_dtype = jnp.dtype(out_dtype)

    # ---- Hoisted projections: one (B*N, D) x (D, 2) matmul in XLA ----------
    w2 = jnp.stack([weight[0, :D], weight[0, D:]], axis=1).astype(jnp.float32)
    proj = jnp.einsum("bnd,dk->bnk", x, w2,
                      preferred_element_type=jnp.float32)      # (B, N, 2) f32
    u = proj[:, :, 0:1] + bias.astype(jnp.float32)[0]           # (B, N, 1)
    v = jnp.transpose(proj[:, :, 1:2], (0, 2, 1))               # (B, 1, N)

    adj_bytes = adj.dtype.itemsize
    out_bytes = out_dtype.itemsize
    elem_bytes = adj_bytes + out_bytes

    # ---- Fast path: tiny / lane-sparse problems -----------------------------
    # With N < 128 every store is a masked, lane-sparse vst and the fixed
    # pallas_call + per-step overhead dominates; fused XLA wins there.
    if not force_pallas and (N < 128 or B * N * N * elem_bytes < (1 << 20)):
        mixed = (p_asem * jax.nn.sigmoid(u + v)
                 + (1.0 - p_asem) * adj.astype(jnp.float32))
        return mixed.astype(out_dtype)

    # ---- Generation-aware VMEM / per-step byte budget -----------------------
    vmem_cap = _vmem_capacity_bytes()
    if vmem_cap >= 96 * 1024 * 1024:          # v5e / v6e: 128 MiB physical VMEM
        vmem_limit = 64 * 1024 * 1024
        target_bytes = 14 * 1024 * 1024       # adj+out bytes per grid step
    else:                                     # v7x: 64 MiB physical VMEM
        vmem_limit = 32 * 1024 * 1024
        target_bytes = 11 * 1024 * 1024
    # Double-buffered adj+out = 2 * target_bytes (+ tiny u/v), under vmem_limit.

    # ---- Tile selection ------------------------------------------------------
    # TM must be a multiple of 8 (or == N); TN a multiple of 128 (or == N).
    tile_cap = 1024
    while tile_cap > 128 and (min(N, tile_cap) ** 2) * elem_bytes > target_bytes:
        tile_cap //= 2
    TM = N if N <= tile_cap else tile_cap
    TN = N if N <= tile_cap else tile_cap

    # TB: largest divisor of B whose adj+out tiles fit the byte budget, so the
    # final batch block is never padded and step sizes stay uniform.
    per_batch_tile = TM * TN * elem_bytes
    tb_budget = max(1, target_bytes // max(per_batch_tile, 1))
    TB = _largest_divisor_leq(B, tb_budget)

    # Never collapse the grid to a single step: v7x shards whole "parallel"
    # grid steps across its two TensorCores (one idle TC ~= 2x loss here).
    steps_ij = pl.cdiv(N, TM) * pl.cdiv(N, TN)
    if steps_ij == 1:
        if B > 1 and pl.cdiv(B, TB) == 1:
            TB = _largest_divisor_leq(B, max(1, B // 2))
        elif B == 1 and N > 8:
            half = (N + 1) // 2
            tm_half = ((half + 7) // 8) * 8        # multiple of 8, < N -> 2 steps
            if tm_half < N:
                TM = tm_half

    grid = (pl.cdiv(B, TB), pl.cdiv(N, TM), pl.cdiv(N, TN))

    p_arr = jnp.full((1,), p_asem, dtype=jnp.float32)

    grid_spec = pltpu.PrefetchScalarGridSpec(
        num_scalar_prefetch=0,
        grid=grid,
        in_specs=[
            pl.BlockSpec(memory_space=pltpu.MemorySpace.SMEM),          # p_asem
            pl.BlockSpec((TB, TM, 1), lambda b, i, j: (b, i, 0)),       # u
            pl.BlockSpec((TB, 1, TN), lambda b, i, j: (b, 0, j)),       # v
            pl.BlockSpec((TB, TM, TN), lambda b, i, j: (b, i, j)),      # adj
        ],
        out_specs=pl.BlockSpec((TB, TM, TN), lambda b, i, j: (b, i, j)),
    )

    # Advisory cost so XLA schedules the hoisted projection and surrounding ops
    # around this long, memory-bound custom call instead of serializing.
    cost = pl.CostEstimate(
        flops=int(4 * B * N * N),
        transcendentals=int(B * N * N),
        bytes_accessed=int(B * N * N * elem_bytes + 2 * B * N * 4),
    )

    return pl.pallas_call(
        _smatrix_kernel,
        out_shape=jax.ShapeDtypeStruct((B, N, N), out_dtype),
        grid_spec=grid_spec,
        compiler_params=pltpu.CompilerParams(
            dimension_semantics=("parallel", "parallel", "parallel"),
            vmem_limit_bytes=vmem_limit,
        ),
        cost_estimate=cost,
    )(p_arr, u, v, adj)


def _reference(x, adj, weight, bias, p_asem=0.8):
    """Pure-JAX reference mirroring the PyTorch forward literally."""
    B, N, D = x.shape
    xi = jnp.broadcast_to(x[:, :, None, :], (B, N, N, D))
    xj = jnp.broadcast_to(x[:, None, :, :], (B, N, N, D))
    xij = jnp.concatenate([xi, xj], axis=-1)                  # (B, N, N, 2D)
    score = jnp.einsum("bijk,ok->bijo", xij, weight) + bias   # (B, N, N, 1)
    score = jnp.squeeze(score, axis=-1)
    return p_asem * jax.nn.sigmoid(score) + (1.0 - p_asem) * adj


def _reference_lean(x, adj, weight, bias, p_asem=0.8):
    """Same math via the u+v decomposition (no (B,N,N,2D) blowup) for large shapes."""
    B, N, D = x.shape
    w_i = weight[0, :D].astype(jnp.float32)
    w_j = weight[0, D:].astype(jnp.float32)
    u = x.astype(jnp.float32) @ w_i + bias.astype(jnp.float32)[0]   # (B, N)
    v = x.astype(jnp.float32) @ w_j                                 # (B, N)
    score = u[:, :, None] + v[:, None, :]
    return p_asem * jax.nn.sigmoid(score) + (1.0 - p_asem) * adj.astype(jnp.float32)


if __name__ == "__main__":
    # ---- Test 1: tiny shapes, literal-reference check, Pallas path forced ----
    key = jax.random.PRNGKey(0)
    B, N, D = 2, 8, 32  # batch, seq, hidden (in_size = D)
    kx, kadj, kw, kb = jax.random.split(key, 4)
    x = jax.random.normal(kx, (B, N, D), dtype=jnp.float32)
    adj = jax.random.uniform(kadj, (B, N, N), dtype=jnp.float32)

    # Deterministic nn.Linear(2D, 1)-shaped parameters (synthetic init).
    bound = 1.0 / jnp.sqrt(2.0 * D)
    weight = jax.random.uniform(kw, (1, 2 * D), minval=-bound, maxval=bound,
                                dtype=jnp.float32)
    bias = jax.random.uniform(kb, (1,), minval=-bound, maxval=bound,
                              dtype=jnp.float32)

    out = sentence_matrix_layer(x, adj, weight, bias, p_asem=0.8,
                                force_pallas=True)
    out = jax.block_until_ready(out)
    ref = _reference(x, adj, weight, bias, p_asem=0.8)
    assert out.shape == (B, N, N)
    assert jnp.allclose(out, ref, atol=1e-5, rtol=1e-5)

    # ---- Test 2: large N (not a multiple of 128), awkward B -----------------
    # Exercises partial edge blocks on both i and j, the divisor-based TB, and
    # the grid-collapse guard.
    B2, N2, D2 = 3, 1100, 16
    k2 = jax.random.PRNGKey(1)
    k2x, k2adj, k2w, k2b = jax.random.split(k2, 4)
    x2 = jax.random.normal(k2x, (B2, N2, D2), dtype=jnp.float32)
    adj2 = jax.random.uniform(k2adj, (B2, N2, N2), dtype=jnp.float32)
    bound2 = 1.0 / jnp.sqrt(2.0 * D2)
    weight2 = jax.random.uniform(k2w, (1, 2 * D2), minval=-bound2, maxval=bound2,
                                 dtype=jnp.float32)
    bias2 = jax.random.uniform(k2b, (1,), minval=-bound2, maxval=bound2,
                               dtype=jnp.float32)

    out2 = sentence_matrix_layer(x2, adj2, weight2, bias2, p_asem=0.8)
    out2 = jax.block_until_ready(out2)
    ref2 = _reference_lean(x2, adj2, weight2, bias2, p_asem=0.8)
    assert out2.shape == (B2, N2, N2)
    assert jnp.allclose(out2, ref2, atol=1e-5, rtol=1e-5)

    print("KERNEL_OK")
</pallas_src>

<mosaic_0001>
module attributes {stable_mosaic.version = 11 : i64} {
  func.func @_smatrix_kernel(%arg0: i32, %arg1: i32, %arg2: i32, %arg3: memref<1xf32, #tpu.memory_space<smem>>, %arg4: memref<1x8x1xf32, #tpu.memory_space<vmem>>, %arg5: memref<1x1x8xf32, #tpu.memory_space<vmem>>, %arg6: memref<1x8x8xf32, #tpu.memory_space<vmem>>, %arg7: memref<1x8x8xf32, #tpu.memory_space<vmem>>) attributes {dimension_semantics = [#tpu.dimension_semantics<parallel>, #tpu.dimension_semantics<parallel>, #tpu.dimension_semantics<parallel>], iteration_bounds = array<i64: 2, 1, 1>, scalar_prefetch = 0 : i64, scratch_operands = 0 : i64, tpu.core_type = #tpu.core_type<tc>, window_params = [{transform_indices = @transform_0, window_bounds = array<i64: 1>}, {transform_indices = @transform_1, window_bounds = array<i64: 1, 8, 1>}, {transform_indices = @transform_2, window_bounds = array<i64: 1, 1, 8>}, {transform_indices = @transform_3, window_bounds = array<i64: 1, 8, 8>}, {transform_indices = @transform_4, window_bounds = array<i64: 1, 8, 8>}]} {
    %c0 = arith.constant 0 : index
    %0 = memref.load %arg3[%c0] : memref<1xf32, #tpu.memory_space<smem>>
    %c0_0 = arith.constant 0 : index
    %c0_1 = arith.constant 0 : index
    %c0_2 = arith.constant 0 : index
    %1 = vector.load %arg4[%c0_0, %c0_1, %c0_2] : memref<1x8x1xf32, #tpu.memory_space<vmem>>, vector<1x8x1xf32>
    %c0_3 = arith.constant 0 : index
    %c0_4 = arith.constant 0 : index
    %c0_5 = arith.constant 0 : index
    %2 = vector.load %arg5[%c0_3, %c0_4, %c0_5] : memref<1x1x8xf32, #tpu.memory_space<vmem>>, vector<1x1x8xf32>
    %3 = vector.broadcast %1 : vector<1x8x1xf32> to vector<1x8x8xf32>
    %4 = vector.broadcast %2 : vector<1x1x8xf32> to vector<1x8x8xf32>
    %5 = arith.addf %3, %4 : vector<1x8x8xf32>
    %6 = arith.negf %5 : vector<1x8x8xf32>
    %7 = math.exp %6 : vector<1x8x8xf32>
    %cst = arith.constant 1.000000e+00 : f32
    %8 = vector.broadcast %cst : f32 to vector<1x8x8xf32>
    %9 = arith.addf %8, %7 : vector<1x8x8xf32>
    %10 = arith.divf %8, %9 : vector<1x8x8xf32>
    %11 = vector.broadcast %0 : f32 to vector<1x8x8xf32>
    %12 = arith.mulf %11, %10 : vector<1x8x8xf32>
    %cst_6 = arith.constant 1.000000e+00 : f32
    %13 = arith.subf %cst_6, %0 : f32
    %c0_7 = arith.constant 0 : index
    %c0_8 = arith.constant 0 : index
    %c0_9 = arith.constant 0 : index
    %14 = vector.load %arg6[%c0_7, %c0_8, %c0_9] : memref<1x8x8xf32, #tpu.memory_space<vmem>>, vector<1x8x8xf32>
    %15 = vector.broadcast %13 : f32 to vector<1x8x8xf32>
    %16 = arith.mulf %15, %14 : vector<1x8x8xf32>
    %17 = arith.addf %12, %16 : vector<1x8x8xf32>
    %c0_10 = arith.constant 0 : index
    %c0_11 = arith.constant 0 : index
    %c0_12 = arith.constant 0 : index
    %18 = vector.load %arg7[%c0_10, %c0_11, %c0_12] : memref<1x8x8xf32, #tpu.memory_space<vmem>>, vector<1x8x8xf32>
    tpu.vector_store %arg7[%c0_10, %c0_11, %c0_12], %17 {strides = array<i32>} : memref<1x8x8xf32, #tpu.memory_space<vmem>>, vector<1x8x8xf32>,
    return
  }
  func.func @transform_0(%arg0: i32, %arg1: i32, %arg2: i32) -> i32 {
    %c0_i32 = arith.constant 0 : i32
    %c0_i32_0 = arith.constant 0 : i32
    return %c0_i32 : i32
  }
  func.func @transform_1(%arg0: i32, %arg1: i32, %arg2: i32) -> (i32, i32, i32) {
    %c0_i32 = arith.constant 0 : i32
    %c0_i32_0 = arith.constant 0 : i32
    return %arg0, %arg1, %c0_i32 : i32, i32, i32
  }
  func.func @transform_2(%arg0: i32, %arg1: i32, %arg2: i32) -> (i32, i32, i32) {
    %c0_i32 = arith.constant 0 : i32
    %c0_i32_0 = arith.constant 0 : i32
    return %arg0, %c0_i32, %arg2 : i32, i32, i32
  }
  func.func @transform_3(%arg0: i32, %arg1: i32, %arg2: i32) -> (i32, i32, i32) {
    %c0_i32 = arith.constant 0 : i32
    return %arg0, %arg1, %arg2 : i32, i32, i32
  }
  func.func @transform_4(%arg0: i32, %arg1: i32, %arg2: i32) -> (i32, i32, i32) {
    %c0_i32 = arith.constant 0 : i32
    return %arg0, %arg1, %arg2 : i32, i32, i32
  }
}

</mosaic_0001>

<bundles_post_ra>
// kernel: tpu_custom_call.1
= control target key start
LH: loop header
LB: loop body
LE: loop exit
PB: predicated region body
PF: predicated region fallthrough
CT: control target
= control target key end

     0   :  { %s731_s0 = inlined_call_operand.<no memory space> [shape: f32[1], index: 0, kind: input, shape index: {}]   ;;  %s732_s1 = inlined_call_operand.vmem [shape: f32[2,8,1], index: 1, kind: input, shape index: {}]   ;;  %s733_s2 = inlined_call_operand.vmem [shape: f32[2,1,8], index: 2, kind: input, shape index: {}]   ;;  %s734_s3 = inlined_call_operand.vmem [shape: f32[2,8,8], index: 3, kind: input, shape index: {}]   ;;  %s735_s4 = inlined_call_operand.hbm [shape: f32[2,8,8], index: 4, kind: output, shape index: {}]  }
   0x1   :  { %9 = sst [smem:[#allocation2]] %s731_s0 }
   0x2   :  { %10 = vsyncpa [#allocation4], 0 }
   0x3   :  { %12 = vsyncpa [#allocation4 + $0x1], 0  ;;  %s626_s17 = smov 0   ;;  %s628_s18 = smov 0  }
   0x4   :  { %s630_s19 = smov 0   ;;  %s632_s20 = smov 0  }
   0x5   :  { %s634_s21 = smov 0   ;;  %s636_s22 = smov 0  }
   0x6 LB: > { %s443_s0 = sadd.s32 4294967295, %s594_s22   ;;  %s444_s23 = sadd.s32 4294967294, %s594_s22   ;;  %s594_s22 = sphi %s636_s22, %s18_s22   ;;  %s590_s21 = sphi %s634_s21, %s742_s21   ;;  %s586_s20 = sphi %s632_s20, %s741_s20   ;;  %s582_s19 = sphi %s630_s19, %s740_s19   ;;  %s578_s18 = sphi %s628_s18, %s739_s18   ;;  %s574_s17 = sphi %s626_s17, %s738_s17  }
   0x7   : > { %s37_s24 = sadd.s32 1, %s590_s21  ;;  %s155_s25 = sadd.s32 1, %s582_s19 }
   0x8   : > { %p39_p0 = scmp.ge.s32.totalorder %s37_s24, 2  ;;  %p165_p1 = scmp.ne.s32.totalorder %s582_s19, %s578_s18 }
   0x9   : > { %p166_p2 = scmp.eq.s32.totalorder %s443_s0, 1  ;;  %p171_p3 = scmp.ne.s32.totalorder %s578_s18, %s574_s17 }
   0xa   : > { %s744_s24 = smov (%p39_p0, %s37_s24), 0  ;;  %p172_p5 = scmp.eq.s32.totalorder %s444_s23, 1 }
   0xb   : > { %p666_p4 = por %p166_p2, %p165_p1  ;;  %s148_s27 = ssub.s32 %s590_s21, %s744_s24 }
   0xc   : > { %p447_p6 = scmp.ge.s32.totalorder %s594_s22, 1  ;;  %p153_p7 = scmp.eq.s32.totalorder %s148_s27, 0 }
   0xd   : > { %p673_p8 = por %p172_p5, %p171_p3  ;;  %p225_p9 = scmp.lt.s32.totalorder %s594_s22, 3 }
   0xe   : > { %s679_s29 = scalar_select %p153_p7, %s582_s19, %s155_s25  }
   0xf   : > { %p226_p10 = pnand %p447_p6, %p225_p9 }
  0x10   : > { %p269_p11 = scmp.lt.s32.totalorder (!%p226_p10), %s586_s20, 1  ;;  %s292_s12 = sld [smem:[#allocation2]] (!%p226_p10) }
  0x11   : > { %229 = sbr.rel (%p226_p10) target bundleno = 202 (0xca), region = 36  ;;  %s266_s13 = sand.u32 (!%p226_p10), 1, %s578_s18  }
  0x12   : > { %s448_s23 = sshll.u32 (!%p226_p10), %s266_s13, 3  ;;  %s454_s25 = sshll.u32 (!%p226_p10), %s586_s20, 7 }
  0x13   : > { %s268_s27 = scalar_lea.vmem (!%p226_p10), [#allocation3], %s448_s23  ;;  %s597_s10 = smov (!%p226_p10), [#allocation3]  }
  0x16   : > { %v596_v0 = vmov 0   ;;  %s270_s30 = scalar_select %p269_p11, %s586_s20, 1  ;;  %v313_v10 = vstv %s292_s12  ;;  %vm320_vm0 = vcmask 64512  }
  0x17   : > { %513 = vset.pattern.permute.xlu0 %v596_v0  ;;  %s315_s14 = ssub.f32 1.0, %s292_s12 }
  0x18   : > { %s449_s5 = sshll.u32 %s270_s30, 3  ;;  %s281_s11 = scalar_lea.vmem %s733_s2, %s270_s30 }
  0x19   : > { %s275_s8 = scalar_lea.vmem %s732_s1, %s449_s5  ;;  %v451_v2 = vld [vmem:[%s281_s11] ss:$0 sm:$0xff]  ;;  %s291_s0 = scalar_lea.vmem %s734_s3, %s449_s5  ;;  %v317_v9 = vstv %s315_s14 }
  0x1a   : > { %v293_v1 = vld [vmem:[%s275_s8] sm:$0xff]  ;;  %s338_s30 = sshll.u32 %s268_s27, 4  ;;  %s336_s8 = scalar_lea.hbm %s735_s4, %s454_s25  ;;  %s339_s30 = int_to_ptr.vmem [resolvable:$true] %s338_s30 }
  0x1b   : > { %297 = vperm.xlu0 %513, %v293_v1   ;;  %v316_v8 = vld [vmem:[%s291_s0] sm:$0xff]  ;;  %s323_s5 = scalar_lea.sflag [#allocation4], %s266_s13  ;;  %s518_s9 = scalar_lea.vmem %s339_s30, 128 }
  0x1c   : > { %v318_v11 = vmul.f32 %v317_v9, %v316_v8  ;;  %p519_p12 = scmp.ne.s32.totalorder %s339_s30, %s518_s9  ;;  %s522_s11 = sshll.u32 %s597_s10, 4  ;;  %s523_s11 = int_to_ptr.vmem [resolvable:$false] %s522_s11 }
  0x1d   : > { %s524_s20 = scalar_lea.vmem %s523_s11, 256  ;;  %p525_p1 = scmp.lt.s32.totalorder %s339_s30, %s523_s11 }
  0x1e   : > { %p520_p13 = pnand %p519_p12, %p666_p4  ;;  %p526_p2 = scmp.lt.s32.totalorder %s524_s20, %s518_s9 }
  0x20   : > { %p521_p0 = pneg %p520_p13  ;;  %p527_p3 = por %p526_p2, %p525_p1 }
  0x22   : > { %p528_p5 = pnand %p527_p3, %p521_p0 }
  0x96   : > { %v298_v3 = vpop.permute.xlu0 %297 }
  0x97   : > { %v306_v4 = vadd.f32 %v451_v2, %v298_v3 }
  0x99   : > { %v452_v5 = vmul.f32 -1.442695, %v306_v4 }
  0x9b   : > { %514 = vpow2.f32 %v452_v5 }
  0xa8   : > { %v515_v6 = vpop.eup %514 }
  0xa9   : > { %v310_v7 = vadd.f32 1.0, %v515_v6 }
  0xab   : > { %516 = vrcp.f32 %v310_v7 }
  0xb8   : > { %v517_v12 = vpop.eup %516 }
  0xb9   : > { %v314_v13 = vmul.f32 %v517_v12, %v313_v10 }
  0xbb   : > { %v319_v14 = vadd.f32 %v318_v11, %v314_v13 }
  0xbd   : > { %321 = vst.msk [vmem:[%s268_s27] sm:$0xff] %vm320_vm0, %v319_v14 }
  0xbe   : > { %531 = shalt.err (!%p528_p5)
}
  0xbf   : > { %s532_s12 = scalar_lea.hbm %s336_s8, 128  ;;  %s536_s15 = scalar_lea.hbm %s735_s4, 256 }
  0xc0   : > { %p533_p6 = scmp.ne.s32.totalorder %s336_s8, %s532_s12  ;;  %p537_p10 = scmp.lt.s32.totalorder %s336_s8, %s735_s4 }
  0xc1   : > { %p538_p11 = scmp.lt.s32.totalorder %s536_s15, %s532_s12 }
  0xc2   : > { %p534_p7 = pnand %p533_p6, %p666_p4 }
  0xc3   : > { %p539_p12 = por %p538_p11, %p537_p10 }
  0xc4   : > { %p535_p9 = pneg %p534_p7 }
  0xc6   : > { %p540_p13 = pnand %p539_p12, %p535_p9 }
  0xc8   : > { %543 = shalt.err (!%p540_p13)
}
  0xc9   : > { %457 = dma.vmem_to_hbm [thread:$0]  (%p666_p4), %s339_s30, 128, %s336_s8, %s323_s5  }
  0xca PF: > { %p463_p0 = scmp.ge.s32.totalorder %s594_s22, 2  ;;  %s350_s23 = sand.u32 1, %s574_s17  }
  0xcb   : > { %s351_s25 = scalar_lea.sflag [#allocation4], %s350_s23 }
  0xcc   : > { %p460_p1 = pnand %p463_p0, %p673_p8 }
  0xce   : > { %p461_p2 = pneg %p460_p1 }
  0xd0   : > { %569 = dma.done.wait (%p461_p2), %s351_s25, 128  }
  0xd1   : > { %571 = vsyncadd (%p461_p2), %s351_s25, 4294967168  ;;  %s18_s22 = sadd.s32 1, %s594_s22   ;;  %s738_s17 = smov %s578_s18 }
  0xd2   : > { %p15_p3 = scmp.ge.s32.totalorder %s18_s22, 4   ;;  %s739_s18 = smov %s582_s19 }
  0xd3   : > { %s740_s19 = smov %s679_s29  ;;  %s741_s20 = smov %s590_s21 }
  0xd4   : > { %s742_s21 = smov %s744_s24  ;;  %17 = sbr.rel (!%p15_p3) target bundleno = 6 (0x6), region = 77 }
  0xd9   :  { %356 = vsyncpa [#allocation4], 1 }
  0xda   :  { %358 = vsyncpa [#allocation4 + $0x1], 1 }

</bundles_post_ra>
